<compile_context>
chip_gen: v7x
topology: tpu7x:2x2x1
jax: 0.10.0
libtpu: 0.0.40
codegen_flags: <defaults>
</compile_context>

<pallas_src>
import functools

import jax
import jax.numpy as jnp
from jax.experimental import pallas as pl
from jax.experimental.pallas import tpu as pltpu

_EPS = 1e-7
_LANE = 128
# Slab lane widths tried in order (widest first): wider last dim => longer
# contiguous DMA rows, wide unmasked stores, fewer grid steps.
_L_CANDIDATES = (2048, 1024, 512, 256, 128)
# ~1 MiB per input stream per grid step; 5 streams x 2 buffers x 1 MiB = 10 MiB.
_TARGET_TILE_BYTES = 1 << 20
_VMEM_LIMIT = 24 * 1024 * 1024


# ----------------------------- math helpers (in-kernel) -----------------------------

def _recip(x):
    """1/x via EUP vrcp (approx) + one Newton step on the VALU (~1e-6 rel err)."""
    r = pl.reciprocal(x, approx=True)
    return r * (2.0 - x * r)


def _digamma(x):
    """Digamma for x > 0: psi(x) = psi(x+6) - sum_{k=0..5} 1/(x+k).

    The six recurrence reciprocals are folded into ONE rational P(x)/Q(x)
    (one reciprocal); the asymptotic series at x+6 adds one more reciprocal
    and one log.  Reciprocals use the approximate EUP vrcp + a VALU Newton
    step, so per digamma the EUP sees ~2 vrcp + 1 log instead of 7 divides.
    """
    p01 = x * (x + 1.0)
    p23 = (x + 2.0) * (x + 3.0)
    p45 = (x + 4.0) * (x + 5.0)
    p2345 = p23 * p45
    q = p01 * p2345
    num = ((2.0 * x + 1.0) * p2345
           + p01 * ((2.0 * x + 5.0) * p45 + (2.0 * x + 9.0) * p23))
    recurrence = num * _recip(q)

    z = x + 6.0
    inv = _recip(z)
    inv2 = inv * inv
    # ln z - 1/(2z) - 1/(12 z^2) + 1/(120 z^4) - 1/(252 z^6)   (z >= 6)
    series = jnp.log(z) - 0.5 * inv - inv2 * (
        (1.0 / 12.0) - inv2 * ((1.0 / 120.0) - inv2 * (1.0 / 252.0)))
    return series - recurrence


def _loss_core(a, b, y):
    a = jnp.maximum(a, _EPS)
    b = jnp.maximum(b, _EPS)
    dg_ab = _digamma(a + b)
    term1 = _digamma(a) - dg_ab
    term2 = _digamma(b) - dg_ab
    # General (soft-label) 3-digamma form, preserving the module semantics.
    return -(y * term1 + (1.0 - y) * term2)


# ----------------------- elementwise kernels (reduction=None) -----------------------

def _elem_kernel(a_ref, b_ref, y_ref, o_ref):
    # Out-of-bounds rows of a partial last block compute garbage that Pallas
    # drops on writeback; no masking needed on this path.
    o_ref[...] = _loss_core(a_ref[...], b_ref[...], y_ref[...])


def _elem_kernel_w(a_ref, b_ref, y_ref, w_ref, o_ref):
    o_ref[...] = _loss_core(a_ref[...], b_ref[...], y_ref[...]) * w_ref[...]


# ----------------------- fused-reduction kernels (sum / mean) -----------------------

def _tail_mask(shape, i, tm, lanes, n_valid):
    # valid flat index < n_valid, decomposed into (row, lane) comparisons to
    # avoid int32 overflow of row*lanes+lane (assumes n_valid fits in int32).
    full_rows = n_valid // lanes
    rem = n_valid - full_rows * lanes
    row = jax.lax.broadcasted_iota(jnp.int32, shape, 0) + i * tm
    lane = jax.lax.broadcasted_iota(jnp.int32, shape, 1)
    return (row < full_rows) | ((row == full_rows) & (lane < rem))


def _reduce_kernel(nv_ref, a_ref, b_ref, y_ref, ps_ref, *, tm, lanes):
    i = pl.program_id(0)
    last = pl.num_programs(0) - 1
    loss = _loss_core(a_ref[...], b_ref[...], y_ref[...])

    @pl.when(i < last)
    def _():  # interior blocks are fully valid: no mask work at all
        ps_ref[...] = jnp.sum(loss, axis=0, keepdims=True)

    @pl.when(i == last)
    def _():  # only the last block can contain padded / out-of-bounds elements
        mask = _tail_mask(loss.shape, i, tm, lanes, nv_ref[0])
        # where() is a select, so NaN/Inf produced by _loss_core on garbage
        # out-of-bounds inputs cannot leak into the kept lanes.
        ps_ref[...] = jnp.sum(jnp.where(mask, loss, 0.0), axis=0, keepdims=True)


def _reduce_kernel_w(nv_ref, a_ref, b_ref, y_ref, w_ref, ps_ref, pw_ref, *, tm, lanes):
    i = pl.program_id(0)
    last = pl.num_programs(0) - 1
    w = w_ref[...]
    loss = _loss_core(a_ref[...], b_ref[...], y_ref[...]) * w

    @pl.when(i < last)
    def _():
        ps_ref[...] = jnp.sum(loss, axis=0, keepdims=True)
        pw_ref[...] = jnp.sum(w, axis=0, keepdims=True)

    @pl.when(i == last)
    def _():
        mask = _tail_mask(loss.shape, i, tm, lanes, nv_ref[0])
        ps_ref[...] = jnp.sum(jnp.where(mask, loss, 0.0), axis=0, keepdims=True)
        pw_ref[...] = jnp.sum(jnp.where(mask, w, 0.0), axis=0, keepdims=True)


# ------------------------------------ host-side -------------------------------------

def _slab_geometry(n):
    """(rows, lanes, pad): widest lane dim that divides n and fills 8 sublanes."""
    for lanes in _L_CANDIDATES:
        if n % lanes == 0 and n // lanes >= 8:
            return n // lanes, lanes, 0
    if n % _LANE == 0:            # small multiple-of-128 input: still copy-free
        return n // _LANE, _LANE, 0
    m = -(-n // _LANE)            # fallback: pad < 128 elems (costs one copy)
    return m, _LANE, m * _LANE - n


def _to_slab(x, m, lanes, pad):
    flat = x.reshape(-1).astype(jnp.float32)
    if pad:
        flat = jnp.pad(flat, (0, pad), constant_values=1.0)  # digamma-safe value
    return flat.reshape(m, lanes)


def _choose_tm(m, lanes):
    """Rows per grid step: single block if it fits the ~1 MiB/stream budget."""
    rows_per_tile = max(8, _TARGET_TILE_BYTES // (lanes * 4))
    if m <= rows_per_tile:
        return m                              # one grid step, zero step overhead
    tm = min(rows_per_tile, -(-m // 2))       # >= 2 blocks once we split (megacore)
    return max(8, (tm // 8) * 8)


@functools.partial(jax.jit, static_argnames=("reduction", "has_weight"))
def _beta_bernoulli_impl(alpha, beta, labels, weighting, reduction, has_weight):
    orig_shape = alpha.shape
    n = int(alpha.size)
    m, lanes, pad = _slab_geometry(n)
    a2 = _to_slab(alpha, m, lanes, pad)
    b2 = _to_slab(beta, m, lanes, pad)
    y2 = _to_slab(labels, m, lanes, pad)
    if has_weight:
        w2 = _to_slab(weighting, m, lanes, pad)

    tm = _choose_tm(m, lanes)
    g = pl.cdiv(m, tm)
    grid = (g,)
    # NOTE: "parallel" lets megacore / dual-TC shard the row-block axis.
    cparams = pltpu.CompilerParams(
        dimension_semantics=("parallel",),
        vmem_limit_bytes=_VMEM_LIMIT,
    )

    if reduction in ("sum", "mean"):
        nv = jnp.array([n], jnp.int32)  # tail bound, read from SMEM in-kernel
        in_spec = pl.BlockSpec((tm, lanes), lambda i, _nv: (i, 0))
        ps_spec = pl.BlockSpec((1, lanes), lambda i, _nv: (i, 0))
        ps_shape = jax.ShapeDtypeStruct((g, lanes), jnp.float32)
        if has_weight:
            kern = functools.partial(_reduce_kernel_w, tm=tm, lanes=lanes)
            ps, pw = pl.pallas_call(
                kern,
                out_shape=(ps_shape, ps_shape),
                grid_spec=pltpu.PrefetchScalarGridSpec(
                    num_scalar_prefetch=1,
                    grid=grid,
                    in_specs=[in_spec, in_spec, in_spec, in_spec],
                    out_specs=(ps_spec, ps_spec),
                ),
                compiler_params=cparams,
            )(nv, a2, b2, y2, w2)
            loss_sum = jnp.sum(ps)
            if reduction == "sum":
                return loss_sum
            return loss_sum / jnp.maximum(jnp.sum(pw), _EPS)
        kern = functools.partial(_reduce_kernel, tm=tm, lanes=lanes)
        ps = pl.pallas_call(
            kern,
            out_shape=ps_shape,
            grid_spec=pltpu.PrefetchScalarGridSpec(
                num_scalar_prefetch=1,
                grid=grid,
                in_specs=[in_spec, in_spec, in_spec],
                out_specs=ps_spec,
            ),
            compiler_params=cparams,
        )(nv, a2, b2, y2)
        loss_sum = jnp.sum(ps)
        if reduction == "sum":
            return loss_sum
        return loss_sum / jnp.float32(n)

    # reduction is None: produce the full elementwise loss slab.
    in_spec = pl.BlockSpec((tm, lanes), lambda i: (i, 0))
    out_shape = jax.ShapeDtypeStruct((m, lanes), jnp.float32)
    if has_weight:
        loss2 = pl.pallas_call(
            _elem_kernel_w,
            out_shape=out_shape,
            grid_spec=pltpu.PrefetchScalarGridSpec(
                num_scalar_prefetch=0,
                grid=grid,
                in_specs=[in_spec, in_spec, in_spec, in_spec],
                out_specs=in_spec,
            ),
            compiler_params=cparams,
        )(a2, b2, y2, w2)
    else:
        loss2 = pl.pallas_call(
            _elem_kernel,
            out_shape=out_shape,
            grid_spec=pltpu.PrefetchScalarGridSpec(
                num_scalar_prefetch=0,
                grid=grid,
                in_specs=[in_spec, in_spec, in_spec],
                out_specs=in_spec,
            ),
            compiler_params=cparams,
        )(a2, b2, y2)
    if pad:
        return loss2.reshape(-1)[:n].reshape(orig_shape)
    return loss2.reshape(orig_shape)


def beta_bernoulli_loss(alpha, beta, labels, weighting=None, reduction=None):
    """JAX/Pallas equivalent of BetaBernoulliLoss.forward (epsilon=1e-7)."""
    has_weight = weighting is not None
    w = weighting if has_weight else jnp.zeros((1,), jnp.float32)
    return _beta_bernoulli_impl(alpha, beta, labels, w, reduction, has_weight)


def _reference(alpha, beta, labels, weighting=None, reduction=None):
    from jax.scipy.special import digamma
    a = jnp.maximum(alpha, _EPS)
    b = jnp.maximum(beta, _EPS)
    term1 = digamma(a) - digamma(a + b)
    term2 = digamma(b) - digamma(a + b)
    loss = -(labels * term1 + (1.0 - labels) * term2)
    if weighting is not None:
        loss = loss * weighting
    if reduction == "sum":
        return jnp.sum(loss)
    if reduction == "mean":
        if weighting is not None:
            return jnp.sum(loss) / jnp.maximum(jnp.sum(weighting), _EPS)
        return jnp.mean(loss)
    return loss


if __name__ == "__main__":
    key = jax.random.PRNGKey(0)
    k1, k2, k3, k4 = jax.random.split(key, 4)
    shape = (2, 4, 16, 16)  # NCHW

    # alpha, beta > 0 (Beta distribution parameters), labels in {0, 1}
    alpha = jax.random.uniform(k1, shape, jnp.float32, minval=0.05, maxval=5.0)
    beta = jax.random.uniform(k2, shape, jnp.float32, minval=0.05, maxval=5.0)
    labels = jax.random.bernoulli(k3, 0.5, shape).astype(jnp.float32)
    weighting = jax.random.uniform(k4, shape, jnp.float32, minval=0.0, maxval=2.0)

    # reduction=None (module default), no weighting
    out = jax.block_until_ready(beta_bernoulli_loss(alpha, beta, labels))
    ref = _reference(alpha, beta, labels)
    assert out.shape == shape
    assert jnp.allclose(out, ref, rtol=1e-4, atol=1e-4), "mismatch (None reduction)"

    # weighted + mean reduction (fused in-kernel partial sums)
    out_m = jax.block_until_ready(
        beta_bernoulli_loss(alpha, beta, labels, weighting, reduction="mean")
    )
    ref_m = _reference(alpha, beta, labels, weighting, reduction="mean")
    assert jnp.allclose(out_m, ref_m, rtol=1e-4, atol=1e-4), "mismatch (mean reduction)"

    # sum reduction (fused in-kernel partial sums)
    out_s = jax.block_until_ready(
        beta_bernoulli_loss(alpha, beta, labels, reduction="sum")
    )
    ref_s = _reference(alpha, beta, labels, reduction="sum")
    assert jnp.allclose(out_s, ref_s, rtol=1e-4, atol=1e-3), "mismatch (sum reduction)"

    print("KERNEL_OK")
</pallas_src>

<mosaic_0001>
module attributes {stable_mosaic.version = 11 : i64} {
  func.func @_elem_kernel(%arg0: i32, %arg1: memref<8x256xf32, #tpu.memory_space<vmem>>, %arg2: memref<8x256xf32, #tpu.memory_space<vmem>>, %arg3: memref<8x256xf32, #tpu.memory_space<vmem>>, %arg4: memref<8x256xf32, #tpu.memory_space<vmem>>) attributes {dimension_semantics = [#tpu.dimension_semantics<parallel>], iteration_bounds = array<i64: 1>, scalar_prefetch = 0 : i64, scratch_operands = 0 : i64, tpu.core_type = #tpu.core_type<tc>, window_params = [{transform_indices = @transform_0, window_bounds = array<i64: 8, 256>}, {transform_indices = @transform_1, window_bounds = array<i64: 8, 256>}, {transform_indices = @transform_2, window_bounds = array<i64: 8, 256>}, {transform_indices = @transform_3, window_bounds = array<i64: 8, 256>}]} {
    %c0 = arith.constant 0 : index
    %c0_0 = arith.constant 0 : index
    %0 = vector.load %arg1[%c0, %c0_0] : memref<8x256xf32, #tpu.memory_space<vmem>>, vector<8x256xf32>
    %c0_1 = arith.constant 0 : index
    %c0_2 = arith.constant 0 : index
    %1 = vector.load %arg2[%c0_1, %c0_2] : memref<8x256xf32, #tpu.memory_space<vmem>>, vector<8x256xf32>
    %c0_3 = arith.constant 0 : index
    %c0_4 = arith.constant 0 : index
    %2 = vector.load %arg3[%c0_3, %c0_4] : memref<8x256xf32, #tpu.memory_space<vmem>>, vector<8x256xf32>
    %cst = arith.constant 1.000000e-07 : f32
    %3 = vector.broadcast %cst : f32 to vector<8x256xf32>
    %4 = arith.maximumf %0, %3 : vector<8x256xf32>
    %cst_5 = arith.constant 1.000000e-07 : f32
    %5 = vector.broadcast %cst_5 : f32 to vector<8x256xf32>
    %6 = arith.maximumf %1, %5 : vector<8x256xf32>
    %7 = arith.addf %4, %6 : vector<8x256xf32>
    %cst_6 = arith.constant 1.000000e+00 : f32
    %8 = vector.broadcast %cst_6 : f32 to vector<8x256xf32>
    %9 = arith.addf %7, %8 : vector<8x256xf32>
    %10 = arith.mulf %7, %9 : vector<8x256xf32>
    %cst_7 = arith.constant 2.000000e+00 : f32
    %11 = vector.broadcast %cst_7 : f32 to vector<8x256xf32>
    %12 = arith.addf %7, %11 : vector<8x256xf32>
    %cst_8 = arith.constant 3.000000e+00 : f32
    %13 = vector.broadcast %cst_8 : f32 to vector<8x256xf32>
    %14 = arith.addf %7, %13 : vector<8x256xf32>
    %15 = arith.mulf %12, %14 : vector<8x256xf32>
    %cst_9 = arith.constant 4.000000e+00 : f32
    %16 = vector.broadcast %cst_9 : f32 to vector<8x256xf32>
    %17 = arith.addf %7, %16 : vector<8x256xf32>
    %cst_10 = arith.constant 5.000000e+00 : f32
    %18 = vector.broadcast %cst_10 : f32 to vector<8x256xf32>
    %19 = arith.addf %7, %18 : vector<8x256xf32>
    %20 = arith.mulf %17, %19 : vector<8x256xf32>
    %21 = arith.mulf %15, %20 : vector<8x256xf32>
    %22 = arith.mulf %10, %21 : vector<8x256xf32>
    %cst_11 = arith.constant 2.000000e+00 : f32
    %23 = vector.broadcast %cst_11 : f32 to vector<8x256xf32>
    %24 = arith.mulf %23, %7 : vector<8x256xf32>
    %cst_12 = arith.constant 1.000000e+00 : f32
    %25 = vector.broadcast %cst_12 : f32 to vector<8x256xf32>
    %26 = arith.addf %24, %25 : vector<8x256xf32>
    %27 = arith.mulf %26, %21 : vector<8x256xf32>
    %cst_13 = arith.constant 2.000000e+00 : f32
    %28 = vector.broadcast %cst_13 : f32 to vector<8x256xf32>
    %29 = arith.mulf %28, %7 : vector<8x256xf32>
    %cst_14 = arith.constant 5.000000e+00 : f32
    %30 = vector.broadcast %cst_14 : f32 to vector<8x256xf32>
    %31 = arith.addf %29, %30 : vector<8x256xf32>
    %32 = arith.mulf %31, %20 : vector<8x256xf32>
    %cst_15 = arith.constant 2.000000e+00 : f32
    %33 = vector.broadcast %cst_15 : f32 to vector<8x256xf32>
    %34 = arith.mulf %33, %7 : vector<8x256xf32>
    %cst_16 = arith.constant 9.000000e+00 : f32
    %35 = vector.broadcast %cst_16 : f32 to vector<8x256xf32>
    %36 = arith.addf %34, %35 : vector<8x256xf32>
    %37 = arith.mulf %36, %15 : vector<8x256xf32>
    %38 = arith.addf %32, %37 : vector<8x256xf32>
    %39 = arith.mulf %10, %38 : vector<8x256xf32>
    %40 = arith.addf %27, %39 : vector<8x256xf32>
    %41 = tpu.reciprocal %22 {approx = true} : vector<8x256xf32> -> vector<8x256xf32>
    %42 = arith.mulf %22, %41 : vector<8x256xf32>
    %cst_17 = arith.constant 2.000000e+00 : f32
    %43 = vector.broadcast %cst_17 : f32 to vector<8x256xf32>
    %44 = arith.subf %43, %42 : vector<8x256xf32>
    %45 = arith.mulf %41, %44 : vector<8x256xf32>
    %46 = arith.mulf %40, %45 : vector<8x256xf32>
    %cst_18 = arith.constant 6.000000e+00 : f32
    %47 = vector.broadcast %cst_18 : f32 to vector<8x256xf32>
    %48 = arith.addf %7, %47 : vector<8x256xf32>
    %49 = tpu.reciprocal %48 {approx = true} : vector<8x256xf32> -> vector<8x256xf32>
    %50 = arith.mulf %48, %49 : vector<8x256xf32>
    %cst_19 = arith.constant 2.000000e+00 : f32
    %51 = vector.broadcast %cst_19 : f32 to vector<8x256xf32>
    %52 = arith.subf %51, %50 : vector<8x256xf32>
    %53 = arith.mulf %49, %52 : vector<8x256xf32>
    %54 = arith.mulf %53, %53 : vector<8x256xf32>
    %55 = math.log %48 : vector<8x256xf32>
    %cst_20 = arith.constant 5.000000e-01 : f32
    %56 = vector.broadcast %cst_20 : f32 to vector<8x256xf32>
    %57 = arith.mulf %56, %53 : vector<8x256xf32>
    %58 = arith.subf %55, %57 : vector<8x256xf32>
    %cst_21 = arith.constant 0.0039682542 : f32
    %59 = vector.broadcast %cst_21 : f32 to vector<8x256xf32>
    %60 = arith.mulf %54, %59 : vector<8x256xf32>
    %cst_22 = arith.constant 0.00833333377 : f32
    %61 = vector.broadcast %cst_22 : f32 to vector<8x256xf32>
    %62 = arith.subf %61, %60 : vector<8x256xf32>
    %63 = arith.mulf %54, %62 : vector<8x256xf32>
    %cst_23 = arith.constant 0.0833333358 : f32
    %64 = vector.broadcast %cst_23 : f32 to vector<8x256xf32>
    %65 = arith.subf %64, %63 : vector<8x256xf32>
    %66 = arith.mulf %54, %65 : vector<8x256xf32>
    %67 = arith.subf %58, %66 : vector<8x256xf32>
    %68 = arith.subf %67, %46 : vector<8x256xf32>
    %cst_24 = arith.constant 1.000000e+00 : f32
    %69 = vector.broadcast %cst_24 : f32 to vector<8x256xf32>
    %70 = arith.addf %4, %69 : vector<8x256xf32>
    %71 = arith.mulf %4, %70 : vector<8x256xf32>
    %cst_25 = arith.constant 2.000000e+00 : f32
    %72 = vector.broadcast %cst_25 : f32 to vector<8x256xf32>
    %73 = arith.addf %4, %72 : vector<8x256xf32>
    %cst_26 = arith.constant 3.000000e+00 : f32
    %74 = vector.broadcast %cst_26 : f32 to vector<8x256xf32>
    %75 = arith.addf %4, %74 : vector<8x256xf32>
    %76 = arith.mulf %73, %75 : vector<8x256xf32>
    %cst_27 = arith.constant 4.000000e+00 : f32
    %77 = vector.broadcast %cst_27 : f32 to vector<8x256xf32>
    %78 = arith.addf %4, %77 : vector<8x256xf32>
    %cst_28 = arith.constant 5.000000e+00 : f32
    %79 = vector.broadcast %cst_28 : f32 to vector<8x256xf32>
    %80 = arith.addf %4, %79 : vector<8x256xf32>
    %81 = arith.mulf %78, %80 : vector<8x256xf32>
    %82 = arith.mulf %76, %81 : vector<8x256xf32>
    %83 = arith.mulf %71, %82 : vector<8x256xf32>
    %cst_29 = arith.constant 2.000000e+00 : f32
    %84 = vector.broadcast %cst_29 : f32 to vector<8x256xf32>
    %85 = arith.mulf %84, %4 : vector<8x256xf32>
    %cst_30 = arith.constant 1.000000e+00 : f32
    %86 = vector.broadcast %cst_30 : f32 to vector<8x256xf32>
    %87 = arith.addf %85, %86 : vector<8x256xf32>
    %88 = arith.mulf %87, %82 : vector<8x256xf32>
    %cst_31 = arith.constant 2.000000e+00 : f32
    %89 = vector.broadcast %cst_31 : f32 to vector<8x256xf32>
    %90 = arith.mulf %89, %4 : vector<8x256xf32>
    %cst_32 = arith.constant 5.000000e+00 : f32
    %91 = vector.broadcast %cst_32 : f32 to vector<8x256xf32>
    %92 = arith.addf %90, %91 : vector<8x256xf32>
    %93 = arith.mulf %92, %81 : vector<8x256xf32>
    %cst_33 = arith.constant 2.000000e+00 : f32
    %94 = vector.broadcast %cst_33 : f32 to vector<8x256xf32>
    %95 = arith.mulf %94, %4 : vector<8x256xf32>
    %cst_34 = arith.constant 9.000000e+00 : f32
    %96 = vector.broadcast %cst_34 : f32 to vector<8x256xf32>
    %97 = arith.addf %95, %96 : vector<8x256xf32>
    %98 = arith.mulf %97, %76 : vector<8x256xf32>
    %99 = arith.addf %93, %98 : vector<8x256xf32>
    %100 = arith.mulf %71, %99 : vector<8x256xf32>
    %101 = arith.addf %88, %100 : vector<8x256xf32>
    %102 = tpu.reciprocal %83 {approx = true} : vector<8x256xf32> -> vector<8x256xf32>
    %103 = arith.mulf %83, %102 : vector<8x256xf32>
    %cst_35 = arith.constant 2.000000e+00 : f32
    %104 = vector.broadcast %cst_35 : f32 to vector<8x256xf32>
    %105 = arith.subf %104, %103 : vector<8x256xf32>
    %106 = arith.mulf %102, %105 : vector<8x256xf32>
    %107 = arith.mulf %101, %106 : vector<8x256xf32>
    %cst_36 = arith.constant 6.000000e+00 : f32
    %108 = vector.broadcast %cst_36 : f32 to vector<8x256xf32>
    %109 = arith.addf %4, %108 : vector<8x256xf32>
    %110 = tpu.reciprocal %109 {approx = true} : vector<8x256xf32> -> vector<8x256xf32>
    %111 = arith.mulf %109, %110 : vector<8x256xf32>
    %cst_37 = arith.constant 2.000000e+00 : f32
    %112 = vector.broadcast %cst_37 : f32 to vector<8x256xf32>
    %113 = arith.subf %112, %111 : vector<8x256xf32>
    %114 = arith.mulf %110, %113 : vector<8x256xf32>
    %115 = arith.mulf %114, %114 : vector<8x256xf32>
    %116 = math.log %109 : vector<8x256xf32>
    %cst_38 = arith.constant 5.000000e-01 : f32
    %117 = vector.broadcast %cst_38 : f32 to vector<8x256xf32>
    %118 = arith.mulf %117, %114 : vector<8x256xf32>
    %119 = arith.subf %116, %118 : vector<8x256xf32>
    %cst_39 = arith.constant 0.0039682542 : f32
    %120 = vector.broadcast %cst_39 : f32 to vector<8x256xf32>
    %121 = arith.mulf %115, %120 : vector<8x256xf32>
    %cst_40 = arith.constant 0.00833333377 : f32
    %122 = vector.broadcast %cst_40 : f32 to vector<8x256xf32>
    %123 = arith.subf %122, %121 : vector<8x256xf32>
    %124 = arith.mulf %115, %123 : vector<8x256xf32>
    %cst_41 = arith.constant 0.0833333358 : f32
    %125 = vector.broadcast %cst_41 : f32 to vector<8x256xf32>
    %126 = arith.subf %125, %124 : vector<8x256xf32>
    %127 = arith.mulf %115, %126 : vector<8x256xf32>
    %128 = arith.subf %119, %127 : vector<8x256xf32>
    %129 = arith.subf %128, %107 : vector<8x256xf32>
    %130 = arith.subf %129, %68 : vector<8x256xf32>
    %cst_42 = arith.constant 1.000000e+00 : f32
    %131 = vector.broadcast %cst_42 : f32 to vector<8x256xf32>
    %132 = arith.addf %6, %131 : vector<8x256xf32>
    %133 = arith.mulf %6, %132 : vector<8x256xf32>
    %cst_43 = arith.constant 2.000000e+00 : f32
    %134 = vector.broadcast %cst_43 : f32 to vector<8x256xf32>
    %135 = arith.addf %6, %134 : vector<8x256xf32>
    %cst_44 = arith.constant 3.000000e+00 : f32
    %136 = vector.broadcast %cst_44 : f32 to vector<8x256xf32>
    %137 = arith.addf %6, %136 : vector<8x256xf32>
    %138 = arith.mulf %135, %137 : vector<8x256xf32>
    %cst_45 = arith.constant 4.000000e+00 : f32
    %139 = vector.broadcast %cst_45 : f32 to vector<8x256xf32>
    %140 = arith.addf %6, %139 : vector<8x256xf32>
    %cst_46 = arith.constant 5.000000e+00 : f32
    %141 = vector.broadcast %cst_46 : f32 to vector<8x256xf32>
    %142 = arith.addf %6, %141 : vector<8x256xf32>
    %143 = arith.mulf %140, %142 : vector<8x256xf32>
    %144 = arith.mulf %138, %143 : vector<8x256xf32>
    %145 = arith.mulf %133, %144 : vector<8x256xf32>
    %cst_47 = arith.constant 2.000000e+00 : f32
    %146 = vector.broadcast %cst_47 : f32 to vector<8x256xf32>
    %147 = arith.mulf %146, %6 : vector<8x256xf32>
    %cst_48 = arith.constant 1.000000e+00 : f32
    %148 = vector.broadcast %cst_48 : f32 to vector<8x256xf32>
    %149 = arith.addf %147, %148 : vector<8x256xf32>
    %150 = arith.mulf %149, %144 : vector<8x256xf32>
    %cst_49 = arith.constant 2.000000e+00 : f32
    %151 = vector.broadcast %cst_49 : f32 to vector<8x256xf32>
    %152 = arith.mulf %151, %6 : vector<8x256xf32>
    %cst_50 = arith.constant 5.000000e+00 : f32
    %153 = vector.broadcast %cst_50 : f32 to vector<8x256xf32>
    %154 = arith.addf %152, %153 : vector<8x256xf32>
    %155 = arith.mulf %154, %143 : vector<8x256xf32>
    %cst_51 = arith.constant 2.000000e+00 : f32
    %156 = vector.broadcast %cst_51 : f32 to vector<8x256xf32>
    %157 = arith.mulf %156, %6 : vector<8x256xf32>
    %cst_52 = arith.constant 9.000000e+00 : f32
    %158 = vector.broadcast %cst_52 : f32 to vector<8x256xf32>
    %159 = arith.addf %157, %158 : vector<8x256xf32>
    %160 = arith.mulf %159, %138 : vector<8x256xf32>
    %161 = arith.addf %155, %160 : vector<8x256xf32>
    %162 = arith.mulf %133, %161 : vector<8x256xf32>
    %163 = arith.addf %150, %162 : vector<8x256xf32>
    %164 = tpu.reciprocal %145 {approx = true} : vector<8x256xf32> -> vector<8x256xf32>
    %165 = arith.mulf %145, %164 : vector<8x256xf32>
    %cst_53 = arith.constant 2.000000e+00 : f32
    %166 = vector.broadcast %cst_53 : f32 to vector<8x256xf32>
    %167 = arith.subf %166, %165 : vector<8x256xf32>
    %168 = arith.mulf %164, %167 : vector<8x256xf32>
    %169 = arith.mulf %163, %168 : vector<8x256xf32>
    %cst_54 = arith.constant 6.000000e+00 : f32
    %170 = vector.broadcast %cst_54 : f32 to vector<8x256xf32>
    %171 = arith.addf %6, %170 : vector<8x256xf32>
    %172 = tpu.reciprocal %171 {approx = true} : vector<8x256xf32> -> vector<8x256xf32>
    %173 = arith.mulf %171, %172 : vector<8x256xf32>
    %cst_55 = arith.constant 2.000000e+00 : f32
    %174 = vector.broadcast %cst_55 : f32 to vector<8x256xf32>
    %175 = arith.subf %174, %173 : vector<8x256xf32>
    %176 = arith.mulf %172, %175 : vector<8x256xf32>
    %177 = arith.mulf %176, %176 : vector<8x256xf32>
    %178 = math.log %171 : vector<8x256xf32>
    %cst_56 = arith.constant 5.000000e-01 : f32
    %179 = vector.broadcast %cst_56 : f32 to vector<8x256xf32>
    %180 = arith.mulf %179, %176 : vector<8x256xf32>
    %181 = arith.subf %178, %180 : vector<8x256xf32>
    %cst_57 = arith.constant 0.0039682542 : f32
    %182 = vector.broadcast %cst_57 : f32 to vector<8x256xf32>
    %183 = arith.mulf %177, %182 : vector<8x256xf32>
    %cst_58 = arith.constant 0.00833333377 : f32
    %184 = vector.broadcast %cst_58 : f32 to vector<8x256xf32>
    %185 = arith.subf %184, %183 : vector<8x256xf32>
    %186 = arith.mulf %177, %185 : vector<8x256xf32>
    %cst_59 = arith.constant 0.0833333358 : f32
    %187 = vector.broadcast %cst_59 : f32 to vector<8x256xf32>
    %188 = arith.subf %187, %186 : vector<8x256xf32>
    %189 = arith.mulf %177, %188 : vector<8x256xf32>
    %190 = arith.subf %181, %189 : vector<8x256xf32>
    %191 = arith.subf %190, %169 : vector<8x256xf32>
    %192 = arith.subf %191, %68 : vector<8x256xf32>
    %193 = arith.mulf %2, %130 : vector<8x256xf32>
    %cst_60 = arith.constant 1.000000e+00 : f32
    %194 = vector.broadcast %cst_60 : f32 to vector<8x256xf32>
    %195 = arith.subf %194, %2 : vector<8x256xf32>
    %196 = arith.mulf %195, %192 : vector<8x256xf32>
    %197 = arith.addf %193, %196 : vector<8x256xf32>
    %cst_61 = arith.constant 0.000000e+00 : f32
    %198 = vector.broadcast %cst_61 : f32 to vector<8x256xf32>
    %199 = arith.subf %198, %197 : vector<8x256xf32>
    %c0_62 = arith.constant 0 : index
    %c0_63 = arith.constant 0 : index
    %200 = vector.load %arg4[%c0_62, %c0_63] : memref<8x256xf32, #tpu.memory_space<vmem>>, vector<8x256xf32>
    tpu.vector_store %arg4[%c0_62, %c0_63], %199 {strides = array<i32>} : memref<8x256xf32, #tpu.memory_space<vmem>>, vector<8x256xf32>,
    return
  }
  func.func @transform_0(%arg0: i32) -> (i32, i32) {
    %c0_i32 = arith.constant 0 : i32
    %c0_i32_0 = arith.constant 0 : i32
    return %arg0, %c0_i32 : i32, i32
  }
  func.func @transform_1(%arg0: i32) -> (i32, i32) {
    %c0_i32 = arith.constant 0 : i32
    %c0_i32_0 = arith.constant 0 : i32
    return %arg0, %c0_i32 : i32, i32
  }
  func.func @transform_2(%arg0: i32) -> (i32, i32) {
    %c0_i32 = arith.constant 0 : i32
    %c0_i32_0 = arith.constant 0 : i32
    return %arg0, %c0_i32 : i32, i32
  }
  func.func @transform_3(%arg0: i32) -> (i32, i32) {
    %c0_i32 = arith.constant 0 : i32
    %c0_i32_0 = arith.constant 0 : i32
    return %arg0, %c0_i32 : i32, i32
  }
}

</mosaic_0001>

<bundles_post_ra>
// kernel: _beta_bernoulli_impl.1
= control target key start
LH: loop header
LB: loop body
LE: loop exit
PB: predicated region body
PF: predicated region fallthrough
CT: control target
= control target key end

     0   :  { %s575_s0 = inlined_call_operand.vmem [shape: f32[8,256], index: 0, kind: input, shape index: {}]   ;;  %s576_s1 = inlined_call_operand.vmem [shape: f32[8,256], index: 1, kind: input, shape index: {}]   ;;  %s577_s2 = inlined_call_operand.vmem [shape: f32[8,256], index: 2, kind: input, shape index: {}]   ;;  %s578_s3 = inlined_call_operand.vmem [shape: f32[8,256], index: 3, kind: output, shape index: {}]  }
   0x1   :  { %v14_v0 = vld [vmem:[%s575_s0] sm:$0xff]  ;;  %v15_v2 = vld [vmem:[%s575_s0 + $0x8] sm:$0xff] }
   0x2   :  { %v16_v1 = vld [vmem:[%s576_s1] sm:$0xff]  ;;  %v17_v3 = vld [vmem:[%s576_s1 + $0x8] sm:$0xff]  ;;  %v366_v4 = vmax.f32 %v14_v0, 1e-07  ;;  %v370_v6 = vmax.f32 %v15_v2, 1e-07 }
   0x3   :  { %v368_v5 = vmax.f32 %v16_v1, 1e-07  ;;  %v372_v7 = vmax.f32 %v17_v3, 1e-07 }
   0x4   :  { %v110_v20 = vadd.f32 1.0, %v366_v4  ;;  %v114_v21 = vadd.f32 2.0, %v366_v4  ;;  %v116_v23 = vadd.f32 3.0, %v366_v4  ;;  %v120_v24 = vadd.f32 4.0, %v366_v4 }
   0x5   :  { %v24_v8 = vadd.f32 %v368_v5, %v366_v4  ;;  %v25_v9 = vadd.f32 %v372_v7, %v370_v6  ;;  %v115_v28 = vadd.f32 2.0, %v370_v6  ;;  %v122_v32 = vadd.f32 5.0, %v366_v4 }
   0x6   :  { %v117_v34 = vadd.f32 3.0, %v370_v6  ;;  %v392_v35 = vadd.f32 6.0, %v366_v4  ;;  %v395_v36 = vadd.f32 6.0, %v370_v6  ;;  %v397_v39 = vmul.f32 %v116_v23, %v114_v21 }
   0x7   :  { %v378_v10 = vadd.f32 6.0, %v24_v8  ;;  %v30_v11 = vadd.f32 2.0, %v24_v8  ;;  %v380_v12 = vadd.f32 6.0, %v25_v9  ;;  %v32_v13 = vadd.f32 3.0, %v24_v8 }
   0x8   :  { %v36_v14 = vadd.f32 4.0, %v24_v8  ;;  %v38_v15 = vadd.f32 5.0, %v24_v8  ;;  %v31_v16 = vadd.f32 2.0, %v25_v9  ;;  %v33_v17 = vadd.f32 3.0, %v25_v9 }
   0x9   :  { %298 = vrcp.f32 %v378_v10  ;;  %v37_v18 = vadd.f32 4.0, %v25_v9  ;;  %v39_v19 = vadd.f32 5.0, %v25_v9  ;;  %v46_v22 = vmul.f32 2.0, %v24_v8 }
   0xa   :  { %300 = vrcp.f32 %v380_v12  ;;  %v26_v25 = vadd.f32 1.0, %v24_v8  ;;  %v34_v26 = vmul.f32 %v32_v13, %v30_v11  ;;  %v40_v27 = vmul.f32 %v38_v15, %v36_v14 }
   0xb   :  { %v27_v29 = vadd.f32 1.0, %v25_v9  ;;  %v35_v30 = vmul.f32 %v33_v17, %v31_v16  ;;  %v41_v31 = vmul.f32 %v39_v19, %v37_v18  ;;  %v47_v33 = vmul.f32 2.0, %v25_v9 }
   0xc   :  { %v52_v37 = vadd.f32 5.0, %v46_v22  ;;  %v56_v38 = vadd.f32 9.0, %v46_v22  ;;  %v121_v40 = vadd.f32 4.0, %v370_v6  ;;  %v28_v41 = vmul.f32 %v26_v25, %v24_v8 }
   0xd   :  { %v42_v42 = vmul.f32 %v40_v27, %v34_v26  ;;  %v123_v43 = vadd.f32 5.0, %v370_v6  ;;  %302 = vrcp.f32 %v392_v35  ;;  %v29_v44 = vmul.f32 %v27_v29, %v25_v9 }
   0xe   :  { %v43_v45 = vmul.f32 %v41_v31, %v35_v30  ;;  %v124_v46 = vmul.f32 %v122_v32, %v120_v24  ;;  %304 = vrcp.f32 %v395_v36  ;;  %v53_v48 = vadd.f32 5.0, %v47_v33 }
   0xf   :  { %v57_v49 = vadd.f32 9.0, %v47_v33  ;;  %v54_v50 = vmul.f32 %v52_v37, %v40_v27  ;;  %v58_v51 = vmul.f32 %v56_v38, %v34_v26  ;;  %v111_v52 = vadd.f32 1.0, %v370_v6 }
  0x10   :  { %v404_v53 = vmul.f32 %v42_v42, %v28_v41  ;;  %v406_v54 = vmul.f32 %v117_v34, %v115_v28  ;;  %v408_v55 = vmul.f32 %v123_v43, %v121_v40  ;;  %v410_v57 = vmul.f32 %v43_v45, %v29_v44 }
  0x11   :  { %v414_v59 = vmul.f32 %v110_v20, %v366_v4  ;;  %v417_v60 = vmul.f32 %v124_v46, %v397_v39  ;;  %v48_v61 = vadd.f32 1.0, %v46_v22  ;;  %v49_v62 = vadd.f32 1.0, %v47_v33 }
  0x12   :  { %v55_v63 = vmul.f32 %v53_v48, %v41_v31  ;;  %v59_v0 = vmul.f32 %v57_v49, %v35_v30  ;;  %v60_v1 = vadd.f32 %v58_v51, %v54_v50  ;;  %v420_v2 = vmul.f32 %v111_v52, %v370_v6 }
  0x13   :  { %v299_v47 = vpop.eup %298  ;;  %v130_v3 = vmul.f32 2.0, %v366_v4  ;;  %306 = vrcp.f32 %v404_v53  ;;  %v427_v9 = vmul.f32 %v408_v55, %v406_v54  ;;  %v131_v11 = vmul.f32 2.0, %v370_v6 }
  0x14   :  { %v301_v56 = vpop.eup %300  ;;  %v80_v58 = vmul.f32 %v299_v47, %v378_v10  ;;  %308 = vrcp.f32 %v410_v57  ;;  %v433_v14 = vmul.f32 %v417_v60, %v414_v59  ;;  %v50_v16 = vmul.f32 %v48_v61, %v42_v42 }
  0x15   :  { %v81_v8 = vmul.f32 %v301_v56, %v380_v12  ;;  %v51_v4 = vmul.f32 %v49_v62, %v43_v45  ;;  %v61_v17 = vadd.f32 %v59_v0, %v55_v63  ;;  %310 = vlog2.f32 %v378_v10 }
  0x16   :  { %v82_v13 = vsub.f32 2.0, %v80_v58  ;;  %v62_v19 = vmul.f32 %v60_v1, %v28_v41  ;;  %312 = vlog2.f32 %v380_v12  ;;  %v132_v20 = vadd.f32 1.0, %v130_v3 }
  0x17   :  { %v303_v15 = vpop.eup %302  ;;  %v136_v21 = vadd.f32 5.0, %v130_v3  ;;  %v83_v6 = vsub.f32 2.0, %v81_v8  ;;  %v439_v22 = vmul.f32 %v427_v9, %v420_v2  ;;  %v137_v23 = vadd.f32 5.0, %v131_v11 }
  0x18   :  { %v305_v18 = vpop.eup %304  ;;  %v140_v24 = vadd.f32 9.0, %v130_v3  ;;  %v441_v25 = vmul.f32 %v299_v47, %v82_v13  ;;  %314 = vrcp.f32 %v433_v14  ;;  %v164_v26 = vmul.f32 %v303_v15, %v392_v35 }
  0x19   :  { %v200_v10 = vadd.f32 2.0, %v368_v5  ;;  %v165_v27 = vmul.f32 %v305_v18, %v395_v36  ;;  %v201_v12 = vadd.f32 2.0, %v372_v7  ;;  %v202_v28 = vadd.f32 3.0, %v368_v5 }
  0x1a   :  { %v206_v29 = vadd.f32 4.0, %v368_v5  ;;  %v203_v30 = vadd.f32 3.0, %v372_v7  ;;  %v207_v31 = vadd.f32 4.0, %v372_v7  ;;  %v208_v32 = vadd.f32 5.0, %v368_v5 }
  0x1b   :  { %v209_v33 = vadd.f32 5.0, %v372_v7  ;;  %v454_v34 = vmul.f32 %v301_v56, %v83_v6  ;;  %v138_v37 = vmul.f32 %v136_v21, %v124_v46  ;;  %v141_v38 = vadd.f32 9.0, %v131_v11 }
  0x1c   :  { %v142_v40 = vmul.f32 %v140_v24, %v397_v39  ;;  %v63_v41 = vmul.f32 %v61_v17, %v29_v44  ;;  %v459_v42 = vmul.f32 %v441_v25, %v441_v25  ;;  %316 = vrcp.f32 %v439_v22 }
  0x1d   :  { %v166_v43 = vsub.f32 2.0, %v164_v26  ;;  %v307_v45 = vpop.eup %306  ;;  %v167_v47 = vsub.f32 2.0, %v165_v27  ;;  %v196_v48 = vadd.f32 1.0, %v368_v5  ;;  %v463_v49 = vmul.f32 %v202_v28, %v200_v10 }
  0x1e   :  { %v465_v50 = vmul.f32 %v208_v32, %v206_v29  ;;  %v309_v46 = vpop.eup %308  ;;  %v133_v51 = vadd.f32 1.0, %v131_v11  ;;  %v197_v39 = vadd.f32 1.0, %v372_v7  ;;  %v468_v44 = vmul.f32 %v203_v30, %v201_v12 }
  0x1f   :  { %v470_v52 = vmul.f32 %v209_v33, %v207_v31  ;;  %v311_v56 = vpop.eup %310  ;;  %v474_v58 = vmul.f32 %v454_v34, %v454_v34  ;;  %v139_v61 = vmul.f32 %v137_v23, %v408_v55  ;;  %v143_v62 = vmul.f32 %v141_v38, %v406_v54 }
  0x20   :  { %v144_v63 = vadd.f32 %v142_v40, %v138_v37  ;;  %v313_v0 = vpop.eup %312  ;;  %v64_v1 = vadd.f32 %v62_v19, %v50_v16  ;;  %v96_v3 = vmul.f32 0.003968254, %v459_v42  ;;  %v479_v8 = vmul.f32 %v303_v15, %v166_v43 }
  0x21   :  { %v68_v11 = vmul.f32 %v307_v45, %v404_v53  ;;  %v482_v13 = vmul.f32 %v305_v18, %v167_v47  ;;  %v485_v17 = vmul.f32 %v196_v48, %v368_v5  ;;  %v489_v21 = vmul.f32 %v465_v50, %v463_v49 }
  0x22   :  { %v315_v55 = vpop.eup %314  ;;  %v65_v54 = vadd.f32 %v63_v41, %v51_v4  ;;  %v134_v6 = vmul.f32 %v132_v20, %v417_v60  ;;  %v493_v16 = vmul.f32 %v197_v39, %v372_v7  ;;  %v497_v15 = vmul.f32 %v470_v52, %v468_v44 }
  0x23   :  { %v97_v53 = vmul.f32 0.003968254, %v474_v58  ;;  %v135_v18 = vmul.f32 %v133_v51, %v427_v9  ;;  %v145_v19 = vadd.f32 %v143_v62, %v139_v61  ;;  %v146_v23 = vmul.f32 %v144_v63, %v414_v59 }
  0x24   :  { %v69_v24 = vmul.f32 %v309_v46, %v410_v57  ;;  %v98_v26 = vsub.f32 0.008333334, %v96_v3  ;;  %v505_v60 = vmul.f32 %v479_v8, %v479_v8  ;;  %318 = vlog2.f32 %v392_v35 }
  0x25   :  { %v70_v4 = vsub.f32 2.0, %v68_v11  ;;  %v510_v20 = vmul.f32 %v482_v13, %v482_v13  ;;  %v514_v9 = vmul.f32 %v489_v21, %v485_v17  ;;  %v246_v59 = vadd.f32 6.0, %v368_v5 }
  0x26   :  { %v317_v10 = vpop.eup %316  ;;  %v152_v57 = vmul.f32 %v315_v55, %v433_v14  ;;  %320 = vlog2.f32 %v395_v36  ;;  %v521_v27 = vmul.f32 %v497_v15, %v493_v16  ;;  %v247_v35 = vadd.f32 6.0, %v372_v7 }
  0x27   :  { %v89_v12 = vmul.f32 0.6931472, %v311_v56  ;;  %v99_v28 = vsub.f32 0.008333334, %v97_v53  ;;  %v147_v29 = vmul.f32 %v145_v19, %v420_v2  ;;  %322 = vrcp.f32 %v246_v59 }
  0x28   :  { %v71_v30 = vsub.f32 2.0, %v69_v24  ;;  %v100_v31 = vmul.f32 %v98_v26, %v459_v42  ;;  %v180_v32 = vmul.f32 0.003968254, %v505_v60  ;;  %324 = vrcp.f32 %v247_v35 }
  0x29   :  { %v72_v14 = vmul.f32 %v307_v45, %v70_v4  ;;  %v153_v36 = vmul.f32 %v317_v10, %v439_v22  ;;  %v181_v33 = vmul.f32 0.003968254, %v510_v20  ;;  %326 = vrcp.f32 %v514_v9 }
  0x2a   :  { %v92_v37 = vmul.f32 0.5, %v441_v25  ;;  %v154_v38 = vsub.f32 2.0, %v152_v57  ;;  %v216_v40 = vmul.f32 2.0, %v368_v5  ;;  %328 = vrcp.f32 %v521_v27 }
  0x2b   :  { %v101_v2 = vmul.f32 %v99_v28, %v474_v58  ;;  %v148_v41 = vadd.f32 %v146_v23, %v134_v6  ;;  %v149_v43 = vadd.f32 %v147_v29, %v135_v18  ;;  %v217_v47 = vmul.f32 2.0, %v372_v7 }
  0x2c   :  { %v73_v45 = vmul.f32 %v309_v46, %v71_v30  ;;  %v91_v48 = vmul.f32 0.6931472, %v313_v0  ;;  %v102_v22 = vsub.f32 0.083333336, %v100_v31  ;;  %v182_v51 = vsub.f32 0.008333334, %v180_v32 }
  0x2d   :  { %v535_v39 = vmul.f32 %v72_v14, %v64_v1  ;;  %v93_v56 = vmul.f32 0.5, %v454_v34  ;;  %v155_v25 = vsub.f32 2.0, %v153_v36  ;;  %v183_v61 = vsub.f32 0.008333334, %v181_v33 }
  0x2e   :  { %v319_v62 = vpop.eup %318  ;;  %v94_v5 = vsub.f32 %v89_v12, %v92_v37  ;;  %v156_v63 = vmul.f32 %v315_v55, %v154_v38  ;;  %v222_v3 = vadd.f32 5.0, %v216_v40  ;;  %v226_v11 = vadd.f32 9.0, %v216_v40 }
  0x2f   :  { %v103_v53 = vsub.f32 0.083333336, %v101_v2  ;;  %v223_v6 = vadd.f32 5.0, %v217_v47  ;;  %v227_v18 = vadd.f32 9.0, %v217_v47  ;;  %330 = vlog2.f32 %v246_v59 }
  0x30   :  { %v321_v7 = vpop.eup %320  ;;  %v538_v46 = vmul.f32 %v73_v45, %v65_v54  ;;  %v104_v0 = vmul.f32 %v102_v22, %v459_v42  ;;  %v184_v1 = vmul.f32 %v182_v51, %v505_v60  ;;  %332 = vlog2.f32 %v247_v35 }
  0x31   :  { %v323_v34 = vpop.eup %322  ;;  %v95_v19 = vsub.f32 %v91_v48, %v93_v56  ;;  %v157_v23 = vmul.f32 %v317_v10, %v155_v25  ;;  %v173_v24 = vmul.f32 0.6931472, %v319_v62  ;;  %v185_v55 = vmul.f32 %v183_v61, %v510_v20 }
  0x32   :  { %v325_v26 = vpop.eup %324  ;;  %v543_v4 = vmul.f32 %v156_v63, %v148_v41  ;;  %v224_v57 = vmul.f32 %v222_v3, %v465_v50  ;;  %v228_v12 = vmul.f32 %v226_v11, %v463_v49  ;;  %v250_v54 = vmul.f32 %v323_v34, %v246_v59 }
  0x33   :  { %v327_v28 = vpop.eup %326  ;;  %v105_v42 = vmul.f32 %v103_v53, %v474_v58  ;;  %v225_v29 = vmul.f32 %v223_v6, %v470_v52  ;;  %v229_v30 = vmul.f32 %v227_v18, %v468_v44  ;;  %v251_v31 = vmul.f32 %v325_v26, %v247_v35 }
  0x34   :  { %v329_v10 = vpop.eup %328  ;;  %v106_v32 = vsub.f32 %v94_v5, %v104_v0  ;;  %v176_v14 = vmul.f32 0.5, %v479_v8  ;;  %v186_v36 = vsub.f32 0.083333336, %v184_v1  ;;  %v252_v33 = vsub.f32 2.0, %v250_v54 }
  0x35   :  { %v175_v37 = vmul.f32 0.6931472, %v321_v7  ;;  %v177_v50 = vmul.f32 0.5, %v482_v13  ;;  %v187_v38 = vsub.f32 0.083333336, %v185_v55  ;;  %v253_v49 = vsub.f32 2.0, %v251_v31 }
  0x36   :  { %v218_v59 = vadd.f32 1.0, %v216_v40  ;;  %v230_v2 = vadd.f32 %v228_v12, %v224_v57  ;;  %v238_v58 = vmul.f32 %v327_v28, %v514_v9  ;;  %v254_v41 = vmul.f32 %v323_v34, %v252_v33 }
  0x37   :  { %v219_v52 = vadd.f32 1.0, %v217_v47  ;;  %v231_v45 = vadd.f32 %v229_v30, %v225_v29  ;;  %v239_v44 = vmul.f32 %v329_v10, %v521_v27  ;;  %v255_v35 = vmul.f32 %v325_v26, %v253_v49 }
  0x38   :  { %v159_v48 = vmul.f32 %v157_v23, %v149_v43  ;;  %v178_v22 = vsub.f32 %v173_v24, %v176_v14  ;;  %v188_v8 = vmul.f32 %v186_v36, %v505_v60  ;;  %v256_v51 = vmul.f32 %v254_v41, %v254_v41 }
  0x39   :  { %v331_v56 = vpop.eup %330  ;;  %v107_v25 = vsub.f32 %v95_v19, %v105_v42  ;;  %v179_v13 = vsub.f32 %v175_v37, %v177_v50  ;;  %v189_v61 = vmul.f32 %v187_v38, %v510_v20  ;;  %v257_v40 = vmul.f32 %v255_v35, %v255_v35 }
  0x3a   :  { %v333_v62 = vpop.eup %332  ;;  %v220_v9 = vmul.f32 %v218_v59, %v489_v21  ;;  %v232_v47 = vmul.f32 %v230_v2, %v485_v17  ;;  %v240_v5 = vsub.f32 2.0, %v238_v58  ;;  %v266_v63 = vmul.f32 0.003968254, %v256_v51 }
  0x3b   :  { %v221_v27 = vmul.f32 %v219_v52, %v497_v15  ;;  %v233_v43 = vmul.f32 %v231_v45, %v493_v16  ;;  %v241_v3 = vsub.f32 2.0, %v239_v44  ;;  %v267_v60 = vmul.f32 0.003968254, %v257_v40 }
  0x3c   :  { %v190_v11 = vsub.f32 %v178_v22, %v188_v8  ;;  %v259_v53 = vmul.f32 0.6931472, %v331_v56  ;;  %v262_v6 = vmul.f32 0.5, %v254_v41  ;;  %v268_v18 = vsub.f32 0.008333334, %v266_v63 }
  0x3d   :  { %v191_v7 = vsub.f32 %v179_v13, %v189_v61  ;;  %v261_v20 = vmul.f32 0.6931472, %v333_v62  ;;  %v263_v0 = vmul.f32 0.5, %v255_v35  ;;  %v269_v1 = vsub.f32 0.008333334, %v267_v60 }
  0x3e   :  { %v234_v34 = vadd.f32 %v232_v47, %v220_v9  ;;  %v242_v21 = vmul.f32 %v327_v28, %v240_v5  ;;  %v270_v19 = vmul.f32 %v268_v18, %v256_v51  ;;  %v235_v17 = vadd.f32 %v233_v43, %v221_v27  ;;  %v18_v28 = vld [vmem:[%s577_s2] sm:$0xff] }
  0x3f   :  { %v243_v23 = vmul.f32 %v329_v10, %v241_v3  ;;  %v271_v24 = vmul.f32 %v269_v1, %v257_v40  ;;  %v108_v15 = vsub.f32 %v106_v32, %v535_v39  ;;  %v192_v16 = vsub.f32 %v190_v11, %v543_v4  ;;  %v19_v39 = vld [vmem:[%s577_s2 + $0x8] sm:$0xff] }
  0x40   :  { %v264_v55 = vsub.f32 %v259_v53, %v262_v6  ;;  %v272_v26 = vsub.f32 0.083333336, %v270_v19  ;;  %v109_v57 = vsub.f32 %v107_v25, %v538_v46  ;;  %v193_v12 = vsub.f32 %v191_v7, %v159_v48 }
  0x41   :  { %v265_v54 = vsub.f32 %v261_v20, %v263_v0  ;;  %v273_v42 = vsub.f32 0.083333336, %v271_v24  ;;  %v244_v29 = vmul.f32 %v242_v21, %v234_v34  ;;  %v245_v31 = vmul.f32 %v243_v23, %v235_v17 }
  0x42   :  { %v274_v30 = vmul.f32 %v272_v26, %v256_v51  ;;  %v194_v4 = vsub.f32 %v192_v16, %v108_v15  ;;  %v195_v14 = vsub.f32 %v193_v12, %v109_v57  ;;  %v284_v33 = vsub.f32 1.0, %v18_v28 }
  0x43   :  { %v275_v10 = vmul.f32 %v273_v42, %v257_v40  ;;  %v285_v50 = vsub.f32 1.0, %v19_v39 }
  0x44   :  { %v276_v32 = vsub.f32 %v264_v55, %v274_v30  ;;  %v282_v49 = vmul.f32 %v194_v4, %v18_v28  ;;  %v283_v2 = vmul.f32 %v195_v14, %v19_v39 }
  0x45   :  { %v277_v36 = vsub.f32 %v265_v54, %v275_v10 }
  0x46   :  { %v278_v46 = vsub.f32 %v276_v32, %v244_v29 }
  0x47   :  { %v279_v37 = vsub.f32 %v277_v36, %v245_v31 }
  0x48   :  { %v280_v38 = vsub.f32 %v278_v46, %v108_v15 }
  0x49   :  { %v281_v59 = vsub.f32 %v279_v37, %v109_v57 }
  0x4a   :  { %v286_v58 = vmul.f32 %v284_v33, %v280_v38 }
  0x4b   :  { %v287_v41 = vmul.f32 %v285_v50, %v281_v59 }
  0x4c   :  { %v288_v52 = vadd.f32 %v286_v58, %v282_v49 }
  0x4d   :  { %v289_v45 = vadd.f32 %v287_v41, %v283_v2 }
  0x4e   :  { %v290_v44 = vsub.f32 0.0, %v288_v52 }
  0x4f   :  { %v291_v35 = vsub.f32 0.0, %v289_v45 }
  0x50   :  { %292 = vst [vmem:[%s578_s3] sm:$0xff] %v290_v44 }
  0x51   :  { %293 = vst [vmem:[%s578_s3 + $0x8] sm:$0xff] %v291_v35 }

</bundles_post_ra>
